<compile_context>
chip_gen: v6e
topology: v6e:2x2x1
jax: 0.10.0
libtpu: 0.0.40
codegen_flags: <defaults>
</compile_context>

<pallas_src>
import jax
import jax.numpy as jnp
from jax.experimental import pallas as pl
from jax.experimental.pallas import tpu as pltpu

_LANE = 128
_COUT_BLOCK = 8  # output-channel chunk kept live in vregs per inner loop


def _spectral_mac_kernel(x_ref, w_ref, o_ref):
    """One mode-block of out[b,o,m] = sum_i x[b,i,m] * w[i,o,m] (complex).

    x_ref : (2, Cin,  B,   MB)  [0]=real, [1]=imag
    w_ref : (2, Cin,  Cout, MB)
    o_ref : (2, B,    Cout, MB)
    """
    _, Cin, B, MB = x_ref.shape
    Cout = w_ref.shape[2]

    # Block the output channels so the accumulators stay small (vreg-resident)
    # and each output chunk is written exactly once.
    for o0 in range(0, Cout, _COUT_BLOCK):
        cb = min(_COUT_BLOCK, Cout - o0)

        def mac(i, acc):
            acc_r, acc_i = acc
            # Whole-tile leading-dim indexing: no sublane extract per i.
            xr = x_ref[0, i][:, None, :]                 # (B, 1, MB)
            xi = x_ref[1, i][:, None, :]
            wr = w_ref[0, i, o0:o0 + cb][None, :, :]     # (1, cb, MB)
            wi = w_ref[1, i, o0:o0 + cb][None, :, :]
            # (a + ib)(c + id) = (ac - bd) + i(ad + bc)
            return (acc_r + (xr * wr - xi * wi),
                    acc_i + (xr * wi + xi * wr))

        acc0 = (jnp.zeros((B, cb, MB), jnp.float32),
                jnp.zeros((B, cb, MB), jnp.float32))

        if Cin >= 16:
            # Partial unroll keeps LLO scheduling effective without vreg bloat.
            acc_r, acc_i = jax.lax.fori_loop(0, Cin, mac, acc0, unroll=4)
        else:
            acc_r, acc_i = acc0
            for i in range(Cin):
                acc_r, acc_i = mac(i, (acc_r, acc_i))

        o_ref[0, :, o0:o0 + cb, :] = acc_r
        o_ref[1, :, o0:o0 + cb, :] = acc_i


def _generation_config():
    """(target bytes streamed per grid step, vmem_limit_bytes), per TPU gen."""
    try:
        kind = jax.devices()[0].device_kind.lower()
    except Exception:  # pragma: no cover
        kind = ""
    if "v7" in kind:
        # 64 MiB physical VMEM, 2 TensorCores: smaller blocks, >=2 grid steps.
        return 4 << 20, 48 * 1024 * 1024
    if "v5" in kind or "v6" in kind:
        # 128 MiB physical VMEM: bigger blocks get closer to HBM roofline.
        return 8 << 20, 96 * 1024 * 1024
    return 4 << 20, 48 * 1024 * 1024


def _choose_mode_block(B, Cin, Cout, MP, target_bytes):
    """Lane-multiple block on the mode axis: ~target_bytes streamed per step,
    and >=2 grid steps whenever MP allows (so both v7x TCs get work)."""
    bytes_per_mode = 4 * 2 * (Cin * B + Cin * Cout + B * Cout)
    mb = max(_LANE, (target_bytes // bytes_per_mode) // _LANE * _LANE)
    mb = min(mb, MP)
    if MP >= 2 * _LANE and mb > MP // 2:
        mb = max(_LANE, (MP // 2) // _LANE * _LANE)
    while MP % mb != 0:  # MP is a multiple of _LANE, so this terminates
        mb -= _LANE
    return mb


def _compl_mul_pallas(x_pack, w_pack, *, mode_block=None):
    """x_pack: (2,Cin,B,MP) f32; w_pack: (2,Cin,Cout,MP) f32
    -> (2,B,Cout,MP) f32 (real/imag of the complex channel contraction)."""
    _, Cin, B, MP = x_pack.shape
    Cout = w_pack.shape[2]
    target_bytes, vmem_limit = _generation_config()
    MB = (_choose_mode_block(B, Cin, Cout, MP, target_bytes)
          if mode_block is None else mode_block)
    assert MP % MB == 0 and MB % _LANE == 0

    x_spec = pl.BlockSpec((2, Cin, B, MB), lambda m: (0, 0, 0, m))
    w_spec = pl.BlockSpec((2, Cin, Cout, MB), lambda m: (0, 0, 0, m))
    o_spec = pl.BlockSpec((2, B, Cout, MB), lambda m: (0, 0, 0, m))

    return pl.pallas_call(
        _spectral_mac_kernel,
        out_shape=jax.ShapeDtypeStruct((2, B, Cout, MP), jnp.float32),
        grid_spec=pltpu.PrefetchScalarGridSpec(
            num_scalar_prefetch=0,
            grid=(MP // MB,),
            in_specs=[x_spec, w_spec],
            out_specs=o_spec,
        ),
        compiler_params=pltpu.CompilerParams(
            dimension_semantics=("parallel",),
            vmem_limit_bytes=vmem_limit,
        ),
    )(x_pack, w_pack)


def pack_spectral_weights(weights1, weights2, modes1, modes2):
    """Pack (Cin,Cout,m1,m2) complex weights ONCE at init time into the
    kernel-ready fused layout: f32 array of shape (2, Cin, Cout, MP)."""
    Cin, Cout = weights1.shape[:2]
    M2 = 2 * modes1 * modes2
    MP = max(_LANE, ((M2 + _LANE - 1) // _LANE) * _LANE)
    w = jnp.concatenate([weights1, weights2], axis=2).reshape(Cin, Cout, M2)
    w_ri = jnp.stack([jnp.real(w), jnp.imag(w)], axis=0).astype(jnp.float32)
    return jnp.pad(w_ri, ((0, 0), (0, 0), (0, 0), (0, MP - M2)))


def spectral_conv2d_fast(x, w_pack, modes1, modes2):
    """Forward pass of SpectralConv2d_fast.

    x       : (B, Cin, H, W) float32
    w_pack  : (2, Cin, Cout, MP) float32 — output of pack_spectral_weights
    returns : (B, Cout, H, W) float32
    """
    B, Cin, H, W = x.shape
    Cout = w_pack.shape[2]
    MP = w_pack.shape[-1]
    m1, m2 = modes1, modes2
    M2 = 2 * m1 * m2
    Wf = W // 2 + 1
    assert 2 * m1 <= H and m2 <= Wf, "kept modes exceed the FFT grid"

    # TODO(synk): rfft2/irfft2 have no Pallas TPU primitive; done in plain JAX.
    x_ft = jnp.fft.rfft2(x)  # (B, Cin, H, Wf) complex64

    # Corner mode blocks; mode axis is trailing; Cin moved to the leading axis
    # so the kernel indexes whole tiles per input channel.
    top = x_ft[:, :, :m1, :m2]
    bot = x_ft[:, :, H - m1:, :m2]
    x_sel = jnp.concatenate([top, bot], axis=2).reshape(B, Cin, M2)
    x_sel = jnp.transpose(x_sel, (1, 0, 2))                       # (Cin, B, M2)
    x_ri = jnp.stack([jnp.real(x_sel), jnp.imag(x_sel)], axis=0)  # (2,Cin,B,M2)
    x_pack = jnp.pad(x_ri.astype(jnp.float32),
                     ((0, 0), (0, 0), (0, 0), (0, MP - M2)))

    o_pack = _compl_mul_pallas(x_pack, w_pack)      # (2, B, Cout, MP)

    out_c = (o_pack[0, :, :, :M2]
             + 1j * o_pack[1, :, :, :M2]).astype(jnp.complex64)
    out_c = out_c.reshape(B, Cout, 2 * m1, m2)

    # Assemble out_ft with pad + concat (no zeros-then-scatter passes).
    pad_w = ((0, 0), (0, 0), (0, 0), (0, Wf - m2))
    top_full = jnp.pad(out_c[:, :, :m1], pad_w)          # (B, Cout, m1, Wf)
    bot_full = jnp.pad(out_c[:, :, m1:], pad_w)          # (B, Cout, m1, Wf)
    mid = jnp.zeros((B, Cout, H - 2 * m1, Wf), jnp.complex64)
    out_ft = jnp.concatenate([top_full, mid, bot_full], axis=2)

    return jnp.fft.irfft2(out_ft, s=(H, W)).astype(jnp.float32)


def _reference(x, weights1, weights2, modes1, modes2):
    """Pure-JAX reference mirroring the PyTorch module exactly."""
    B, Cin, H, W = x.shape
    Cout = weights1.shape[1]
    Wf = W // 2 + 1
    x_ft = jnp.fft.rfft2(x)
    out_ft = jnp.zeros((B, Cout, H, Wf), dtype=jnp.complex64)
    out_ft = out_ft.at[:, :, :modes1, :modes2].set(
        jnp.einsum('bixy,ioxy->boxy', x_ft[:, :, :modes1, :modes2], weights1))
    out_ft = out_ft.at[:, :, -modes1:, :modes2].set(
        jnp.einsum('bixy,ioxy->boxy', x_ft[:, :, -modes1:, :modes2], weights2))
    return jnp.fft.irfft2(out_ft, s=(H, W)).astype(jnp.float32)


def _make_weights(key, Cin, Cout, m1, m2):
    scale = 1.0 / (Cin * Cout)
    k1, k2, k3, k4 = jax.random.split(key, 4)
    shp = (Cin, Cout, m1, m2)
    # torch.rand(..., dtype=cfloat): real & imag uniform in [0,1), scaled.
    w1 = (scale * jax.random.uniform(k1, shp)
          + 1j * scale * jax.random.uniform(k2, shp)).astype(jnp.complex64)
    w2 = (scale * jax.random.uniform(k3, shp)
          + 1j * scale * jax.random.uniform(k4, shp)).astype(jnp.complex64)
    return w1, w2


def _run_case(key, B, Cin, Cout, H, W, m1, m2):
    kx, kw = jax.random.split(key)
    x = jax.random.normal(kx, (B, Cin, H, W), dtype=jnp.float32)
    w1, w2 = _make_weights(kw, Cin, Cout, m1, m2)
    w_pack = pack_spectral_weights(w1, w2, m1, m2)     # once, at init time

    fwd = jax.jit(spectral_conv2d_fast, static_argnums=(2, 3))
    out = jax.block_until_ready(fwd(x, w_pack, m1, m2))
    ref = jax.block_until_ready(_reference(x, w1, w2, m1, m2))
    assert out.shape == (B, Cout, H, W)
    assert jnp.allclose(out, ref, atol=1e-5, rtol=1e-5), "mismatch vs reference"


if __name__ == "__main__":
    key = jax.random.PRNGKey(0)
    k1, k2 = jax.random.split(key)

    # Case 1: the module's nominal small shape (grid=(1,), unrolled Cin path).
    _run_case(k1, B=2, Cin=4, Cout=4, H=16, W=16, m1=4, m2=4)

    # Case 2: multi-block grid (MP//MB >= 2), Cout blocking, fori_loop path.
    _run_case(k2, B=2, Cin=16, Cout=8, H=32, W=32, m1=8, m2=12)

    print("KERNEL_OK")
</pallas_src>

<mosaic_0001>
module attributes {stable_mosaic.version = 11 : i64} {
  func.func @_spectral_mac_kernel(%arg0: i32, %arg1: memref<2x4x2x128xf32, #tpu.memory_space<vmem>>, %arg2: memref<2x4x4x128xf32, #tpu.memory_space<vmem>>, %arg3: memref<2x2x4x128xf32, #tpu.memory_space<vmem>>) attributes {dimension_semantics = [#tpu.dimension_semantics<parallel>], iteration_bounds = array<i64: 1>, scalar_prefetch = 0 : i64, scratch_operands = 0 : i64, tpu.core_type = #tpu.core_type<tc>, window_params = [{transform_indices = @transform_0, window_bounds = array<i64: 2, 4, 2, 128>}, {transform_indices = @transform_1, window_bounds = array<i64: 2, 4, 4, 128>}, {transform_indices = @transform_2, window_bounds = array<i64: 2, 2, 4, 128>}]} {
    %cst = arith.constant 0.000000e+00 : f32
    %0 = vector.broadcast %cst : f32 to vector<2x4x128xf32>
    %cst_0 = arith.constant 0.000000e+00 : f32
    %1 = vector.broadcast %cst_0 : f32 to vector<2x4x128xf32>
    %c0 = arith.constant 0 : index
    %c0_1 = arith.constant 0 : index
    %c0_2 = arith.constant 0 : index
    %c0_3 = arith.constant 0 : index
    %2 = vector.load %arg1[%c0, %c0_1, %c0_2, %c0_3] : memref<2x4x2x128xf32, #tpu.memory_space<vmem>>, vector<1x1x2x128xf32>
    %3 = vector.shape_cast %2 : vector<1x1x2x128xf32> to vector<2x128xf32>
    %4 = vector.shape_cast %3 : vector<2x128xf32> to vector<2x1x128xf32>
    %c1 = arith.constant 1 : index
    %c0_4 = arith.constant 0 : index
    %c0_5 = arith.constant 0 : index
    %c0_6 = arith.constant 0 : index
    %5 = vector.load %arg1[%c1, %c0_4, %c0_5, %c0_6] : memref<2x4x2x128xf32, #tpu.memory_space<vmem>>, vector<1x1x2x128xf32>
    %6 = vector.shape_cast %5 : vector<1x1x2x128xf32> to vector<2x128xf32>
    %7 = vector.shape_cast %6 : vector<2x128xf32> to vector<2x1x128xf32>
    %c0_7 = arith.constant 0 : index
    %c0_8 = arith.constant 0 : index
    %c0_9 = arith.constant 0 : index
    %c0_10 = arith.constant 0 : index
    %8 = vector.load %arg2[%c0_7, %c0_8, %c0_9, %c0_10] : memref<2x4x4x128xf32, #tpu.memory_space<vmem>>, vector<1x1x4x128xf32>
    %9 = vector.shape_cast %8 : vector<1x1x4x128xf32> to vector<4x128xf32>
    %10 = vector.shape_cast %9 : vector<4x128xf32> to vector<1x4x128xf32>
    %c1_11 = arith.constant 1 : index
    %c0_12 = arith.constant 0 : index
    %c0_13 = arith.constant 0 : index
    %c0_14 = arith.constant 0 : index
    %11 = vector.load %arg2[%c1_11, %c0_12, %c0_13, %c0_14] : memref<2x4x4x128xf32, #tpu.memory_space<vmem>>, vector<1x1x4x128xf32>
    %12 = vector.shape_cast %11 : vector<1x1x4x128xf32> to vector<4x128xf32>
    %13 = vector.shape_cast %12 : vector<4x128xf32> to vector<1x4x128xf32>
    %14 = vector.broadcast %4 : vector<2x1x128xf32> to vector<2x4x128xf32>
    %15 = vector.broadcast %10 : vector<1x4x128xf32> to vector<2x4x128xf32>
    %16 = arith.mulf %14, %15 : vector<2x4x128xf32>
    %17 = vector.broadcast %7 : vector<2x1x128xf32> to vector<2x4x128xf32>
    %18 = vector.broadcast %13 : vector<1x4x128xf32> to vector<2x4x128xf32>
    %19 = arith.mulf %17, %18 : vector<2x4x128xf32>
    %20 = arith.subf %16, %19 : vector<2x4x128xf32>
    %21 = arith.addf %0, %20 : vector<2x4x128xf32>
    %22 = vector.broadcast %4 : vector<2x1x128xf32> to vector<2x4x128xf32>
    %23 = vector.broadcast %13 : vector<1x4x128xf32> to vector<2x4x128xf32>
    %24 = arith.mulf %22, %23 : vector<2x4x128xf32>
    %25 = vector.broadcast %7 : vector<2x1x128xf32> to vector<2x4x128xf32>
    %26 = vector.broadcast %10 : vector<1x4x128xf32> to vector<2x4x128xf32>
    %27 = arith.mulf %25, %26 : vector<2x4x128xf32>
    %28 = arith.addf %24, %27 : vector<2x4x128xf32>
    %29 = arith.addf %1, %28 : vector<2x4x128xf32>
    %c0_15 = arith.constant 0 : index
    %c1_16 = arith.constant 1 : index
    %c0_17 = arith.constant 0 : index
    %c0_18 = arith.constant 0 : index
    %30 = vector.load %arg1[%c0_15, %c1_16, %c0_17, %c0_18] : memref<2x4x2x128xf32, #tpu.memory_space<vmem>>, vector<1x1x2x128xf32>
    %31 = vector.shape_cast %30 : vector<1x1x2x128xf32> to vector<2x128xf32>
    %32 = vector.shape_cast %31 : vector<2x128xf32> to vector<2x1x128xf32>
    %c1_19 = arith.constant 1 : index
    %c1_20 = arith.constant 1 : index
    %c0_21 = arith.constant 0 : index
    %c0_22 = arith.constant 0 : index
    %33 = vector.load %arg1[%c1_19, %c1_20, %c0_21, %c0_22] : memref<2x4x2x128xf32, #tpu.memory_space<vmem>>, vector<1x1x2x128xf32>
    %34 = vector.shape_cast %33 : vector<1x1x2x128xf32> to vector<2x128xf32>
    %35 = vector.shape_cast %34 : vector<2x128xf32> to vector<2x1x128xf32>
    %c0_23 = arith.constant 0 : index
    %c1_24 = arith.constant 1 : index
    %c0_25 = arith.constant 0 : index
    %c0_26 = arith.constant 0 : index
    %36 = vector.load %arg2[%c0_23, %c1_24, %c0_25, %c0_26] : memref<2x4x4x128xf32, #tpu.memory_space<vmem>>, vector<1x1x4x128xf32>
    %37 = vector.shape_cast %36 : vector<1x1x4x128xf32> to vector<4x128xf32>
    %38 = vector.shape_cast %37 : vector<4x128xf32> to vector<1x4x128xf32>
    %c1_27 = arith.constant 1 : index
    %c1_28 = arith.constant 1 : index
    %c0_29 = arith.constant 0 : index
    %c0_30 = arith.constant 0 : index
    %39 = vector.load %arg2[%c1_27, %c1_28, %c0_29, %c0_30] : memref<2x4x4x128xf32, #tpu.memory_space<vmem>>, vector<1x1x4x128xf32>
    %40 = vector.shape_cast %39 : vector<1x1x4x128xf32> to vector<4x128xf32>
    %41 = vector.shape_cast %40 : vector<4x128xf32> to vector<1x4x128xf32>
    %42 = vector.broadcast %32 : vector<2x1x128xf32> to vector<2x4x128xf32>
    %43 = vector.broadcast %38 : vector<1x4x128xf32> to vector<2x4x128xf32>
    %44 = arith.mulf %42, %43 : vector<2x4x128xf32>
    %45 = vector.broadcast %35 : vector<2x1x128xf32> to vector<2x4x128xf32>
    %46 = vector.broadcast %41 : vector<1x4x128xf32> to vector<2x4x128xf32>
    %47 = arith.mulf %45, %46 : vector<2x4x128xf32>
    %48 = arith.subf %44, %47 : vector<2x4x128xf32>
    %49 = arith.addf %21, %48 : vector<2x4x128xf32>
    %50 = vector.broadcast %32 : vector<2x1x128xf32> to vector<2x4x128xf32>
    %51 = vector.broadcast %41 : vector<1x4x128xf32> to vector<2x4x128xf32>
    %52 = arith.mulf %50, %51 : vector<2x4x128xf32>
    %53 = vector.broadcast %35 : vector<2x1x128xf32> to vector<2x4x128xf32>
    %54 = vector.broadcast %38 : vector<1x4x128xf32> to vector<2x4x128xf32>
    %55 = arith.mulf %53, %54 : vector<2x4x128xf32>
    %56 = arith.addf %52, %55 : vector<2x4x128xf32>
    %57 = arith.addf %29, %56 : vector<2x4x128xf32>
    %c0_31 = arith.constant 0 : index
    %c2 = arith.constant 2 : index
    %c0_32 = arith.constant 0 : index
    %c0_33 = arith.constant 0 : index
    %58 = vector.load %arg1[%c0_31, %c2, %c0_32, %c0_33] : memref<2x4x2x128xf32, #tpu.memory_space<vmem>>, vector<1x1x2x128xf32>
    %59 = vector.shape_cast %58 : vector<1x1x2x128xf32> to vector<2x128xf32>
    %60 = vector.shape_cast %59 : vector<2x128xf32> to vector<2x1x128xf32>
    %c1_34 = arith.constant 1 : index
    %c2_35 = arith.constant 2 : index
    %c0_36 = arith.constant 0 : index
    %c0_37 = arith.constant 0 : index
    %61 = vector.load %arg1[%c1_34, %c2_35, %c0_36, %c0_37] : memref<2x4x2x128xf32, #tpu.memory_space<vmem>>, vector<1x1x2x128xf32>
    %62 = vector.shape_cast %61 : vector<1x1x2x128xf32> to vector<2x128xf32>
    %63 = vector.shape_cast %62 : vector<2x128xf32> to vector<2x1x128xf32>
    %c0_38 = arith.constant 0 : index
    %c2_39 = arith.constant 2 : index
    %c0_40 = arith.constant 0 : index
    %c0_41 = arith.constant 0 : index
    %64 = vector.load %arg2[%c0_38, %c2_39, %c0_40, %c0_41] : memref<2x4x4x128xf32, #tpu.memory_space<vmem>>, vector<1x1x4x128xf32>
    %65 = vector.shape_cast %64 : vector<1x1x4x128xf32> to vector<4x128xf32>
    %66 = vector.shape_cast %65 : vector<4x128xf32> to vector<1x4x128xf32>
    %c1_42 = arith.constant 1 : index
    %c2_43 = arith.constant 2 : index
    %c0_44 = arith.constant 0 : index
    %c0_45 = arith.constant 0 : index
    %67 = vector.load %arg2[%c1_42, %c2_43, %c0_44, %c0_45] : memref<2x4x4x128xf32, #tpu.memory_space<vmem>>, vector<1x1x4x128xf32>
    %68 = vector.shape_cast %67 : vector<1x1x4x128xf32> to vector<4x128xf32>
    %69 = vector.shape_cast %68 : vector<4x128xf32> to vector<1x4x128xf32>
    %70 = vector.broadcast %60 : vector<2x1x128xf32> to vector<2x4x128xf32>
    %71 = vector.broadcast %66 : vector<1x4x128xf32> to vector<2x4x128xf32>
    %72 = arith.mulf %70, %71 : vector<2x4x128xf32>
    %73 = vector.broadcast %63 : vector<2x1x128xf32> to vector<2x4x128xf32>
    %74 = vector.broadcast %69 : vector<1x4x128xf32> to vector<2x4x128xf32>
    %75 = arith.mulf %73, %74 : vector<2x4x128xf32>
    %76 = arith.subf %72, %75 : vector<2x4x128xf32>
    %77 = arith.addf %49, %76 : vector<2x4x128xf32>
    %78 = vector.broadcast %60 : vector<2x1x128xf32> to vector<2x4x128xf32>
    %79 = vector.broadcast %69 : vector<1x4x128xf32> to vector<2x4x128xf32>
    %80 = arith.mulf %78, %79 : vector<2x4x128xf32>
    %81 = vector.broadcast %63 : vector<2x1x128xf32> to vector<2x4x128xf32>
    %82 = vector.broadcast %66 : vector<1x4x128xf32> to vector<2x4x128xf32>
    %83 = arith.mulf %81, %82 : vector<2x4x128xf32>
    %84 = arith.addf %80, %83 : vector<2x4x128xf32>
    %85 = arith.addf %57, %84 : vector<2x4x128xf32>
    %c0_46 = arith.constant 0 : index
    %c3 = arith.constant 3 : index
    %c0_47 = arith.constant 0 : index
    %c0_48 = arith.constant 0 : index
    %86 = vector.load %arg1[%c0_46, %c3, %c0_47, %c0_48] : memref<2x4x2x128xf32, #tpu.memory_space<vmem>>, vector<1x1x2x128xf32>
    %87 = vector.shape_cast %86 : vector<1x1x2x128xf32> to vector<2x128xf32>
    %88 = vector.shape_cast %87 : vector<2x128xf32> to vector<2x1x128xf32>
    %c1_49 = arith.constant 1 : index
    %c3_50 = arith.constant 3 : index
    %c0_51 = arith.constant 0 : index
    %c0_52 = arith.constant 0 : index
    %89 = vector.load %arg1[%c1_49, %c3_50, %c0_51, %c0_52] : memref<2x4x2x128xf32, #tpu.memory_space<vmem>>, vector<1x1x2x128xf32>
    %90 = vector.shape_cast %89 : vector<1x1x2x128xf32> to vector<2x128xf32>
    %91 = vector.shape_cast %90 : vector<2x128xf32> to vector<2x1x128xf32>
    %c0_53 = arith.constant 0 : index
    %c3_54 = arith.constant 3 : index
    %c0_55 = arith.constant 0 : index
    %c0_56 = arith.constant 0 : index
    %92 = vector.load %arg2[%c0_53, %c3_54, %c0_55, %c0_56] : memref<2x4x4x128xf32, #tpu.memory_space<vmem>>, vector<1x1x4x128xf32>
    %93 = vector.shape_cast %92 : vector<1x1x4x128xf32> to vector<4x128xf32>
    %94 = vector.shape_cast %93 : vector<4x128xf32> to vector<1x4x128xf32>
    %c1_57 = arith.constant 1 : index
    %c3_58 = arith.constant 3 : index
    %c0_59 = arith.constant 0 : index
    %c0_60 = arith.constant 0 : index
    %95 = vector.load %arg2[%c1_57, %c3_58, %c0_59, %c0_60] : memref<2x4x4x128xf32, #tpu.memory_space<vmem>>, vector<1x1x4x128xf32>
    %96 = vector.shape_cast %95 : vector<1x1x4x128xf32> to vector<4x128xf32>
    %97 = vector.shape_cast %96 : vector<4x128xf32> to vector<1x4x128xf32>
    %98 = vector.broadcast %88 : vector<2x1x128xf32> to vector<2x4x128xf32>
    %99 = vector.broadcast %94 : vector<1x4x128xf32> to vector<2x4x128xf32>
    %100 = arith.mulf %98, %99 : vector<2x4x128xf32>
    %101 = vector.broadcast %91 : vector<2x1x128xf32> to vector<2x4x128xf32>
    %102 = vector.broadcast %97 : vector<1x4x128xf32> to vector<2x4x128xf32>
    %103 = arith.mulf %101, %102 : vector<2x4x128xf32>
    %104 = arith.subf %100, %103 : vector<2x4x128xf32>
    %105 = arith.addf %77, %104 : vector<2x4x128xf32>
    %106 = vector.broadcast %88 : vector<2x1x128xf32> to vector<2x4x128xf32>
    %107 = vector.broadcast %97 : vector<1x4x128xf32> to vector<2x4x128xf32>
    %108 = arith.mulf %106, %107 : vector<2x4x128xf32>
    %109 = vector.broadcast %91 : vector<2x1x128xf32> to vector<2x4x128xf32>
    %110 = vector.broadcast %94 : vector<1x4x128xf32> to vector<2x4x128xf32>
    %111 = arith.mulf %109, %110 : vector<2x4x128xf32>
    %112 = arith.addf %108, %111 : vector<2x4x128xf32>
    %113 = arith.addf %85, %112 : vector<2x4x128xf32>
    %c0_61 = arith.constant 0 : index
    %c0_62 = arith.constant 0 : index
    %c0_63 = arith.constant 0 : index
    %c0_64 = arith.constant 0 : index
    %114 = vector.load %arg3[%c0_61, %c0_62, %c0_63, %c0_64] : memref<2x2x4x128xf32, #tpu.memory_space<vmem>>, vector<1x2x4x128xf32>
    %115 = vector.shape_cast %114 : vector<1x2x4x128xf32> to vector<2x4x128xf32>
    %116 = vector.shape_cast %105 : vector<2x4x128xf32> to vector<1x2x4x128xf32>
    tpu.vector_store %arg3[%c0_61, %c0_62, %c0_63, %c0_64], %116 {strides = array<i32>} : memref<2x2x4x128xf32, #tpu.memory_space<vmem>>, vector<1x2x4x128xf32>,
    %c1_65 = arith.constant 1 : index
    %c0_66 = arith.constant 0 : index
    %c0_67 = arith.constant 0 : index
    %c0_68 = arith.constant 0 : index
    %117 = vector.load %arg3[%c1_65, %c0_66, %c0_67, %c0_68] : memref<2x2x4x128xf32, #tpu.memory_space<vmem>>, vector<1x2x4x128xf32>
    %118 = vector.shape_cast %117 : vector<1x2x4x128xf32> to vector<2x4x128xf32>
    %119 = vector.shape_cast %113 : vector<2x4x128xf32> to vector<1x2x4x128xf32>
    tpu.vector_store %arg3[%c1_65, %c0_66, %c0_67, %c0_68], %119 {strides = array<i32>} : memref<2x2x4x128xf32, #tpu.memory_space<vmem>>, vector<1x2x4x128xf32>,
    return
  }
  func.func @transform_0(%arg0: i32) -> (i32, i32, i32, i32) {
    %c0_i32 = arith.constant 0 : i32
    %c0_i32_0 = arith.constant 0 : i32
    %c0_i32_1 = arith.constant 0 : i32
    %c0_i32_2 = arith.constant 0 : i32
    return %c0_i32, %c0_i32_0, %c0_i32_1, %arg0 : i32, i32, i32, i32
  }
  func.func @transform_1(%arg0: i32) -> (i32, i32, i32, i32) {
    %c0_i32 = arith.constant 0 : i32
    %c0_i32_0 = arith.constant 0 : i32
    %c0_i32_1 = arith.constant 0 : i32
    %c0_i32_2 = arith.constant 0 : i32
    return %c0_i32, %c0_i32_0, %c0_i32_1, %arg0 : i32, i32, i32, i32
  }
  func.func @transform_2(%arg0: i32) -> (i32, i32, i32, i32) {
    %c0_i32 = arith.constant 0 : i32
    %c0_i32_0 = arith.constant 0 : i32
    %c0_i32_1 = arith.constant 0 : i32
    %c0_i32_2 = arith.constant 0 : i32
    return %c0_i32, %c0_i32_0, %c0_i32_1, %arg0 : i32, i32, i32, i32
  }
}

</mosaic_0001>

<bundles_post_ra>
// kernel: reverse.0
= control target key start
LH: loop header
LB: loop body
LE: loop exit
PB: predicated region body
PF: predicated region fallthrough
CT: control target
= control target key end

     0   :  { %v72_v3 = vlaneseq  ;;  %v65_v9 = vld [vmem:[#allocation0 + $0x7] ss:$-1 sm:$0xff]  ;;  %v79_v12 = vld [vmem:[#allocation0 + $0x17] ss:$-1 sm:$0xff]  ;;  %s331_s0 = inlined_call_operand.vmem [shape: f32[2,4,16,7], index: 0, kind: input, shape index: {}]   ;;  %s332_s1 = inlined_call_operand.vmem [shape: f32[2,4,16,7], index: 1, kind: output, shape index: {}]  }
   0x1   :  { %v45_v0 = vld [vmem:[%s331_s0] sm:$0xff]  ;;  %v47_v1 = vld [vmem:[%s331_s0 + $0x8] sm:$0xff]  ;;  %v49_v2 = vld [vmem:[%s331_s0 + $0x10] sm:$0xff]  ;;  %v66_v10 = vrot.slane %v65_v9, 1  ;;  %v80_v14 = vrot.slane %v79_v12, 1 }
   0x2   :  { %46 = vst [vmem:[#allocation0 + $0x8] sm:$0xff] %v45_v0  ;;  %48 = vst [vmem:[#allocation0 + $0x18] sm:$0xff] %v47_v1  ;;  %v51_v4 = vld [vmem:[%s331_s0 + $0x18] sm:$0xff]  ;;  %v53_v5 = vld [vmem:[%s331_s0 + $0x20] sm:$0xff]  ;;  %v73_v11 = vshrl.u32 %v72_v3, 7 }
   0x3   :  { %50 = vst [vmem:[#allocation0 + $0x28] sm:$0xff] %v49_v2  ;;  %v55_v6 = vld [vmem:[%s331_s0 + $0x28] sm:$0xff]  ;;  %52 = vst [vmem:[#allocation0 + $0x38] sm:$0xff] %v51_v4  ;;  %v57_v7 = vld [vmem:[%s331_s0 + $0x30] sm:$0xff] }
   0x4   :  { %54 = vst [vmem:[#allocation0 + $0x48] sm:$0xff] %v53_v5  ;;  %56 = vst [vmem:[#allocation0 + $0x58] sm:$0xff] %v55_v6  ;;  %v59_v8 = vld [vmem:[%s331_s0 + $0x38] sm:$0xff]  ;;  %v93_v13 = vld [vmem:[#allocation0 + $0x27] ss:$-1 sm:$0xff]  ;;  %vm74_vm0 = vcmp.lt.s32.totalorder %v73_v11, 7 }
   0x5   :  { %58 = vst [vmem:[#allocation0 + $0x68] sm:$0xff] %v57_v7  ;;  %60 = vst [vmem:[#allocation0 + $0x78] sm:$0xff] %v59_v8  ;;  %v94_v15 = vrot.slane %v93_v13, 1  ;;  %v107_v16 = vld [vmem:[#allocation0 + $0x37] ss:$-1 sm:$0xff] }
   0x6   :  { %67 = vst [vmem:[#allocation1] sm:$0xff] %v66_v10  ;;  %v108_v17 = vrot.slane %v107_v16, 1  ;;  %v121_v18 = vld [vmem:[#allocation0 + $0x47] ss:$-1 sm:$0xff]  ;;  %v135_v19 = vld [vmem:[#allocation0 + $0x57] ss:$-1 sm:$0xff] }
   0x7   :  { %81 = vst [vmem:[#allocation1 + $0x8] sm:$0xff] %v80_v14  ;;  %95 = vst [vmem:[#allocation1 + $0x10] sm:$0xff] %v94_v15  ;;  %v122_v20 = vrot.slane %v121_v18, 1  ;;  %v136_v21 = vrot.slane %v135_v19, 1  ;;  %v149_v22 = vld [vmem:[#allocation0 + $0x67] ss:$-1 sm:$0xff] }
   0x8   :  { %v163_v23 = vld [vmem:[#allocation0 + $0x77] ss:$-1 sm:$0xff]  ;;  %109 = vst [vmem:[#allocation1 + $0x18] sm:$0xff] %v108_v17  ;;  %v150_v24 = vrot.slane %v149_v22, 1 }
   0x9   :  { %v164_v25 = vrot.slane %v163_v23, 1  ;;  %v70_v26 = vld [vmem:[#allocation0 + $0xf] ss:$-1 sm:$0xff]  ;;  %v84_v27 = vld [vmem:[#allocation0 + $0x1f] ss:$-1 sm:$0xff]  ;;  %123 = vst [vmem:[#allocation1 + $0x20] sm:$0xff] %v122_v20 }
   0xa   :  { %v98_v28 = vld [vmem:[#allocation0 + $0x2f] ss:$-1 sm:$0xff]  ;;  %137 = vst [vmem:[#allocation1 + $0x28] sm:$0xff] %v136_v21  ;;  %v71_v29 = vrot.slane %v70_v26, 1  ;;  %v85_v30 = vrot.slane %v84_v27, 1  ;;  %151 = vst [vmem:[#allocation1 + $0x30] sm:$0xff] %v150_v24 }
   0xb   :  { %v99_v31 = vrot.slane %v98_v28, 1  ;;  %v112_v32 = vld [vmem:[#allocation0 + $0x3f] ss:$-1 sm:$0xff]  ;;  %165 = vst [vmem:[#allocation1 + $0x38] sm:$0xff] %v164_v25  ;;  %v126_v34 = vld [vmem:[#allocation0 + $0x4f] ss:$-1 sm:$0xff] }
   0xc   :  { %v113_v33 = vrot.slane %v112_v32, 1  ;;  %v140_v35 = vld [vmem:[#allocation0 + $0x5f] ss:$-1 sm:$0xff]  ;;  %75 = vst.msk [vmem:[#allocation1] sm:$0xff] %vm74_vm0, %v71_v29  ;;  %89 = vst.msk [vmem:[#allocation1 + $0x8] sm:$0xff] %vm74_vm0, %v85_v30  ;;  %v127_v36 = vrot.slane %v126_v34, 1 }
   0xd   :  { %103 = vst.msk [vmem:[#allocation1 + $0x10] sm:$0xff] %vm74_vm0, %v99_v31  ;;  %v141_v37 = vrot.slane %v140_v35, 1  ;;  %v154_v38 = vld [vmem:[#allocation0 + $0x6f] ss:$-1 sm:$0xff]  ;;  %v168_v39 = vld [vmem:[#allocation0 + $0x7f] ss:$-1 sm:$0xff] }
   0xe   :  { %117 = vst.msk [vmem:[#allocation1 + $0x18] sm:$0xff] %vm74_vm0, %v113_v33  ;;  %v155_v40 = vrot.slane %v154_v38, 1  ;;  %v169_v41 = vrot.slane %v168_v39, 1  ;;  %131 = vst.msk [vmem:[#allocation1 + $0x20] sm:$0xff] %vm74_vm0, %v127_v36 }
   0xf   :  { %145 = vst.msk [vmem:[#allocation1 + $0x28] sm:$0xff] %vm74_vm0, %v141_v37 }
  0x10   :  { %159 = vst.msk [vmem:[#allocation1 + $0x30] sm:$0xff] %vm74_vm0, %v155_v40  ;;  %173 = vst.msk [vmem:[#allocation1 + $0x38] sm:$0xff] %vm74_vm0, %v169_v41 }
  0x13   :  { %v216_v42 = vld [vmem:[#allocation1] sm:$0xff]  ;;  %v218_v43 = vld [vmem:[#allocation1 + $0x8] sm:$0xff] }
  0x14   :  { %v220_v44 = vld [vmem:[#allocation1 + $0x10] sm:$0xff]  ;;  %217 = vst [vmem:[%s332_s1] sm:$0xff] %v216_v42  ;;  %219 = vst [vmem:[%s332_s1 + $0x8] sm:$0xff] %v218_v43 }
  0x15   :  { %221 = vst [vmem:[%s332_s1 + $0x10] sm:$0xff] %v220_v44  ;;  %v222_v45 = vld [vmem:[#allocation1 + $0x18] sm:$0xff]  ;;  %v224_v46 = vld [vmem:[#allocation1 + $0x20] sm:$0xff] }
  0x16   :  { %223 = vst [vmem:[%s332_s1 + $0x18] sm:$0xff] %v222_v45  ;;  %v226_v47 = vld [vmem:[#allocation1 + $0x28] sm:$0xff]  ;;  %225 = vst [vmem:[%s332_s1 + $0x20] sm:$0xff] %v224_v46 }
  0x17   :  { %227 = vst [vmem:[%s332_s1 + $0x28] sm:$0xff] %v226_v47  ;;  %v228_v48 = vld [vmem:[#allocation1 + $0x30] sm:$0xff]  ;;  %v230_v49 = vld [vmem:[#allocation1 + $0x38] sm:$0xff] }
  0x18   :  { %229 = vst [vmem:[%s332_s1 + $0x30] sm:$0xff] %v228_v48  ;;  %231 = vst [vmem:[%s332_s1 + $0x38] sm:$0xff] %v230_v49 }

// kernel: spectral_conv2d_fast.1
= control target key start
LH: loop header
LB: loop body
LE: loop exit
PB: predicated region body
PF: predicated region fallthrough
CT: control target
= control target key end

     0   :  { %v24_v0 = vlaneseq  ;;  %v403_v2 = vmov 1966171168   ;;  %s563_s0 = inlined_call_operand.vmem [shape: f32[2,4,2,128], index: 0, kind: input, shape index: {}]   ;;  %s564_s1 = inlined_call_operand.vmem [shape: f32[2,4,4,128], index: 1, kind: input, shape index: {}]   ;;  %s565_s2 = inlined_call_operand.vmem [shape: f32[2,2,4,128], index: 2, kind: output, shape index: {}]  }
   0x1   :  { %v378_v1 = vld.sshfl [vmem:[%s563_s0] sm:$0x11 pattern:$0x75316420]  ;;  %v22_v3 = vunpack.c.l.s4 %v403_v2  ;;  %v443_v14 = vld [vmem:[%s564_s1 + $0x10] sm:$0xf] }
   0x2   :  { %v25_v4 = vshrl.u32 %v24_v0, 7  ;;  %v380_v5 = vld.sshfl [vmem:[%s563_s0 + $0x8] sm:$0x11 pattern:$0x75316420]  ;;  %v20_v9 = vcombine.high %v378_v1, %v378_v1 }
   0x3   :  { %v23_v6 = vunpack.c.0.s8 %v22_v3  ;;  %v383_v7 = vld.sshfl [vmem:[%s563_s0 + $0x2] sm:$0x11 pattern:$0x75316420]  ;;  %v45_v10 = vcombine.high %v380_v5, %v380_v5  ;;  %v448_v15 = vld [vmem:[%s564_s1 + $0x4] sm:$0xf] }
   0x4   :  { %v385_v8 = vld.sshfl [vmem:[%s563_s0 + $0xa] sm:$0x11 pattern:$0x75316420]  ;;  %v433_v12 = vsub.s32 0, %v25_v4  ;;  %v109_v17 = vcombine.high %v383_v7, %v383_v7 }
   0x5   :  { %v431_v11 = vsub.s32 %v23_v6, %v25_v4  ;;  %v438_v13 = vld [vmem:[%s564_s1] sm:$0xf]  ;;  %v389_v16 = vld.sshfl [vmem:[%s563_s0 + $0x4] sm:$0x11 pattern:$0x75316420]  ;;  %v134_v18 = vcombine.high %v385_v8, %v385_v8 }
   0x6   :  { %v460_v23 = vld [vmem:[%s564_s1 + $0x14] sm:$0xf]  ;;  %v391_v24 = vld.sshfl [vmem:[%s563_s0 + $0xc] sm:$0x11 pattern:$0x75316420] }
   0x7   :  { %v27_v19 = vrot.slane %v378_v1, %v431_v11  ;;  %v52_v20 = vrot.slane %v380_v5, %v431_v11  ;;  %v116_v21 = vrot.slane %v383_v7, %v431_v11  ;;  %v141_v22 = vrot.slane %v385_v8, %v431_v11  ;;  %v470_v27 = vld [vmem:[%s564_s1 + $0x8] sm:$0xf]  ;;  %v395_v28 = vld.sshfl [vmem:[%s563_s0 + $0x6] sm:$0x11 pattern:$0x75316420] }
   0x8   :  { %v206_v25 = vrot.slane %v389_v16, %v431_v11  ;;  %v231_v26 = vrot.slane %v391_v24, %v431_v11  ;;  %v34_v29 = vrot.slane %v20_v9, %v431_v11  ;;  %v59_v30 = vrot.slane %v45_v10, %v431_v11  ;;  %v484_v35 = vld [vmem:[%s564_s1 + $0x18] sm:$0xf]  ;;  %v397_v36 = vld.sshfl [vmem:[%s563_s0 + $0xe] sm:$0x11 pattern:$0x75316420] }
   0x9   :  { %v66_v31 = vrot.slane %v27_v19, %v433_v12  ;;  %v78_v32 = vrot.slane %v52_v20, %v433_v12  ;;  %v156_v33 = vrot.slane %v116_v21, %v433_v12  ;;  %v168_v34 = vrot.slane %v141_v22, %v433_v12  ;;  %v500_v45 = vld [vmem:[%s564_s1 + $0xc] sm:$0xf]  ;;  %v505_v46 = vld [vmem:[%s564_s1 + $0x1c] sm:$0xf] }
   0xa   :  { %v246_v37 = vrot.slane %v206_v25, %v433_v12  ;;  %v258_v38 = vrot.slane %v231_v26, %v433_v12  ;;  %v296_v39 = vrot.slane %v395_v28, %v431_v11  ;;  %v321_v40 = vrot.slane %v397_v36, %v431_v11 }
   0xb   :  { %v73_v41 = vmul.f32 %v66_v31, %v438_v13  ;;  %v85_v42 = vmul.f32 %v443_v14, %v78_v32  ;;  %v163_v43 = vmul.f32 %v448_v15, %v156_v33  ;;  %v175_v44 = vmul.f32 %v460_v23, %v168_v34 }
   0xc   :  { %v253_v47 = vmul.f32 %v470_v27, %v246_v37  ;;  %v265_v48 = vmul.f32 %v484_v35, %v258_v38  ;;  %v336_v49 = vrot.slane %v296_v39, %v433_v12  ;;  %v348_v50 = vrot.slane %v321_v40, %v433_v12 }
   0xd   :  { %v87_v51 = vsub.f32 %v73_v41, %v85_v42  ;;  %v177_v52 = vsub.f32 %v163_v43, %v175_v44  ;;  %v70_v53 = vrot.slane %v34_v29, %v433_v12  ;;  %v82_v54 = vrot.slane %v59_v30, %v433_v12 }
   0xe   :  { %v267_v55 = vsub.f32 %v253_v47, %v265_v48  ;;  %v343_v56 = vmul.f32 %v500_v45, %v336_v49  ;;  %v355_v57 = vmul.f32 %v505_v46, %v348_v50  ;;  %v123_v58 = vrot.slane %v109_v17, %v431_v11 }
   0xf   :  { %v179_v59 = vadd.f32 %v177_v52, %v87_v51  ;;  %v74_v60 = vmul.f32 %v70_v53, %v438_v13  ;;  %v86_v61 = vmul.f32 %v443_v14, %v82_v54  ;;  %v148_v62 = vrot.slane %v134_v18, %v431_v11 }
  0x10   :  { %v357_v63 = vsub.f32 %v343_v56, %v355_v57  ;;  %v160_v0 = vrot.slane %v123_v58, %v433_v12  ;;  %v199_v1 = vcombine.high %v389_v16, %v389_v16  ;;  %v224_v2 = vcombine.high %v391_v24, %v391_v24 }
  0x11   :  { %v269_v3 = vadd.f32 %v267_v55, %v179_v59  ;;  %v88_v4 = vsub.f32 %v74_v60, %v86_v61  ;;  %v172_v5 = vrot.slane %v148_v62, %v433_v12  ;;  %v289_v6 = vcombine.high %v395_v28, %v395_v28 }
  0x12   :  { %v164_v7 = vmul.f32 %v448_v15, %v160_v0  ;;  %v213_v8 = vrot.slane %v199_v1, %v431_v11  ;;  %v238_v9 = vrot.slane %v224_v2, %v431_v11  ;;  %v314_v10 = vcombine.high %v397_v36, %v397_v36 }
  0x13   :  { %v359_v17 = vadd.f32 %v357_v63, %v269_v3  ;;  %v176_v18 = vmul.f32 %v460_v23, %v172_v5  ;;  %v303_v19 = vrot.slane %v289_v6, %v431_v11  ;;  %v91_v16 = vmul.f32 %v443_v14, %v66_v31 }
  0x14   :  { %v250_v20 = vrot.slane %v213_v8, %v433_v12  ;;  %v262_v21 = vrot.slane %v238_v9, %v433_v12  ;;  %v328_v22 = vrot.slane %v314_v10, %v431_v11  ;;  %v93_v24 = vmul.f32 %v78_v32, %v438_v13 }
  0x15   :  { %369 = vst [vmem:[%s565_s2] sm:$0xf] %v359_v17  ;;  %v178_v25 = vsub.f32 %v164_v7, %v176_v18  ;;  %v340_v26 = vrot.slane %v303_v19, %v433_v12  ;;  %v181_v28 = vmul.f32 %v460_v23, %v156_v33  ;;  %v183_v29 = vmul.f32 %v448_v15, %v168_v34 }
  0x16   :  { %v254_v30 = vmul.f32 %v470_v27, %v250_v20  ;;  %v266_v31 = vmul.f32 %v484_v35, %v262_v21  ;;  %v352_v36 = vrot.slane %v328_v22, %v433_v12  ;;  %v95_v11 = vadd.f32 %v93_v24, %v91_v16 }
  0x17   :  { %v180_v39 = vadd.f32 %v178_v25, %v88_v4  ;;  %v344_v32 = vmul.f32 %v500_v45, %v340_v26  ;;  %v185_v40 = vadd.f32 %v183_v29, %v181_v28  ;;  %v271_v41 = vmul.f32 %v484_v35, %v246_v37 }
  0x18   :  { %v268_v42 = vsub.f32 %v254_v30, %v266_v31  ;;  %v356_v43 = vmul.f32 %v505_v46, %v352_v36  ;;  %v273_v33 = vmul.f32 %v470_v27, %v258_v38  ;;  %v361_v34 = vmul.f32 %v505_v46, %v336_v49 }
  0x19   :  { %v187_v44 = vadd.f32 %v185_v40, %v95_v11  ;;  %v363_v47 = vmul.f32 %v500_v45, %v348_v50  ;;  %v92_v48 = vmul.f32 %v443_v14, %v70_v53  ;;  %v94_v12 = vmul.f32 %v82_v54, %v438_v13 }
  0x1a   :  { %v270_v51 = vadd.f32 %v268_v42, %v180_v39  ;;  %v358_v52 = vsub.f32 %v344_v32, %v356_v43  ;;  %v275_v55 = vadd.f32 %v273_v33, %v271_v41  ;;  %v182_v56 = vmul.f32 %v460_v23, %v160_v0 }
  0x1b   :  { %v365_v37 = vadd.f32 %v363_v47, %v361_v34  ;;  %v96_v57 = vadd.f32 %v94_v12, %v92_v48  ;;  %v184_v58 = vmul.f32 %v448_v15, %v172_v5  ;;  %v272_v38 = vmul.f32 %v484_v35, %v250_v20 }
  0x1c   :  { %v360_v59 = vadd.f32 %v358_v52, %v270_v51  ;;  %v277_v49 = vadd.f32 %v275_v55, %v187_v44  ;;  %v274_v60 = vmul.f32 %v470_v27, %v262_v21  ;;  %v362_v50 = vmul.f32 %v505_v46, %v340_v26 }
  0x1d   :  { %v186_v14 = vadd.f32 %v184_v58, %v182_v56  ;;  %v364_v13 = vmul.f32 %v500_v45, %v352_v36 }
  0x1e   :  { %370 = vst [vmem:[%s565_s2 + $0x4] sm:$0xf] %v360_v59  ;;  %v367_v23 = vadd.f32 %v365_v37, %v277_v49  ;;  %v276_v53 = vadd.f32 %v274_v60, %v272_v38 }
  0x1f   :  { %v188_v54 = vadd.f32 %v186_v14, %v96_v57  ;;  %v366_v61 = vadd.f32 %v364_v13, %v362_v50 }
  0x20   :  { %400 = vst [vmem:[%s565_s2 + $0x8] sm:$0xf] %v367_v23 }
  0x21   :  { %v278_v15 = vadd.f32 %v276_v53, %v188_v54 }
  0x23   :  { %v368_v35 = vadd.f32 %v366_v61, %v278_v15 }
  0x25   :  { %401 = vst [vmem:[%s565_s2 + $0xc] sm:$0xf] %v368_v35 }

</bundles_post_ra>
